<compile_context>
chip_gen: v7x
topology: tpu7x:2x2x1
jax: 0.10.0
libtpu: 0.0.40
codegen_flags: <defaults>
</compile_context>

<pallas_src>
import functools

import jax
import jax.numpy as jnp
from jax.experimental import pallas as pl
from jax.experimental.pallas import tpu as pltpu

EPS = 1e-5
_LANE = 128
_TARGET_BLOCK_BYTES = 4 << 20  # ~4 MiB x-blocks: >=85% of HBM roofline, modest VMEM


def _round_up(n, m):
    return ((n + m - 1) // m) * m


def _sublane(dtype):
    # f32 -> 8, bf16 -> 16, int8/fp8 -> 32
    return max(8, 32 // jnp.dtype(dtype).itemsize)


def _chip_info():
    """Return (per-core VMEM bytes, TensorCores per chip) with safe defaults."""
    vmem = 64 << 20  # smallest current generation (v7x per-TC); v5e/v6e have 128 MiB
    cores = 2        # assuming 2 TCs only targets a couple more grid steps: harmless
    try:
        info = pltpu.get_tpu_info()
        vmem = int(getattr(info, "vmem_capacity_bytes", vmem))
        for attr in ("num_cores", "core_count", "num_tensorcores"):
            if hasattr(info, attr):
                cores = int(getattr(info, attr))
                break
    except Exception:
        pass
    return vmem, max(1, min(int(cores), 2))


def _footprint_bytes(tile_rows, width, itemsize):
    """Estimated VMEM footprint of one pipelined step of the row kernels."""
    io = 2 * 2 * tile_rows * width * itemsize  # x + out tiles, double-buffered
    tmp = 3 * tile_rows * width * 4            # live f32 temporaries (f32 x copy, x*x, y)
    par = 2 * 2 * width * 4                    # weight/bias tiles (f32 upper bound)
    return io + tmp + par


def _vmem_limit(footprint, vmem_bytes):
    # Ask for what we actually need (+25% and 2 MiB slack for Mosaic internal
    # scratch), never less than the 16 MiB default, never more than 3/4 of the
    # physical per-core VMEM.
    want = max(16 << 20, (footprint * 5) // 4 + (2 << 20))
    return int(min((vmem_bytes * 3) // 4, want))


# ----------------------------------------------------------------------------
# Single-pass kernels (whole hidden dim resident per row tile)
# ----------------------------------------------------------------------------

def _ln_bias_kernel(x_ref, w_ref, b_ref, o_ref):
    # x_ref: (tile_rows, hidden); w_ref/b_ref: (1, hidden)
    x = x_ref[...].astype(jnp.float32)
    inv_h = 1.0 / x.shape[-1]
    s1 = jnp.sum(x, axis=-1, keepdims=True)
    s2 = jnp.sum(x * x, axis=-1, keepdims=True)
    mean = s1 * inv_h
    var = jnp.maximum(s2 * inv_h - mean * mean, 0.0)  # biased var, clamped >= 0
    rstd = jax.lax.rsqrt(var + EPS)
    y = (x - mean) * rstd * w_ref[...].astype(jnp.float32) + b_ref[...].astype(jnp.float32)
    o_ref[...] = y.astype(o_ref.dtype)


def _ln_nobias_kernel(x_ref, w_ref, o_ref):
    x = x_ref[...].astype(jnp.float32)
    inv_h = 1.0 / x.shape[-1]
    s1 = jnp.sum(x, axis=-1, keepdims=True)
    s2 = jnp.sum(x * x, axis=-1, keepdims=True)
    mean = s1 * inv_h
    var = jnp.maximum(s2 * inv_h - mean * mean, 0.0)
    rstd = jax.lax.rsqrt(var + EPS)
    y = (x - mean) * rstd * w_ref[...].astype(jnp.float32)
    o_ref[...] = y.astype(o_ref.dtype)


# ----------------------------------------------------------------------------
# Two-pass (split-hidden) fallback for very large hidden
# ----------------------------------------------------------------------------

def _stats_kernel(x_ref, mean_ref, rstd_ref, s1_ref, s2_ref, *, hidden, tile_h):
    j = pl.program_id(1)

    @pl.when(j == 0)
    def _():
        s1_ref[...] = jnp.zeros_like(s1_ref)
        s2_ref[...] = jnp.zeros_like(s2_ref)

    x = x_ref[...].astype(jnp.float32)
    # Explicitly mask the ragged hidden chunk (OOB columns contain garbage).
    col = jax.lax.broadcasted_iota(jnp.int32, x.shape, 1) + j * tile_h
    x = jnp.where(col < hidden, x, 0.0)
    s1_ref[...] += jnp.sum(x, axis=-1, keepdims=True)
    s2_ref[...] += jnp.sum(x * x, axis=-1, keepdims=True)

    @pl.when(j == pl.num_programs(1) - 1)
    def _():
        inv_h = 1.0 / hidden
        mean = s1_ref[...] * inv_h
        var = jnp.maximum(s2_ref[...] * inv_h - mean * mean, 0.0)
        mean_ref[...] = mean
        rstd_ref[...] = jax.lax.rsqrt(var + EPS)


def _apply_bias_kernel(x_ref, mean_ref, rstd_ref, w_ref, b_ref, o_ref):
    x = x_ref[...].astype(jnp.float32)
    y = (x - mean_ref[...]) * rstd_ref[...] * w_ref[...].astype(jnp.float32) \
        + b_ref[...].astype(jnp.float32)
    o_ref[...] = y.astype(o_ref.dtype)


def _apply_nobias_kernel(x_ref, mean_ref, rstd_ref, w_ref, o_ref):
    x = x_ref[...].astype(jnp.float32)
    y = (x - mean_ref[...]) * rstd_ref[...] * w_ref[...].astype(jnp.float32)
    o_ref[...] = y.astype(o_ref.dtype)


# ----------------------------------------------------------------------------
# Tile picking & wrappers
# ----------------------------------------------------------------------------

def _pick_tile_rows(rows, hidden, dtype, vmem_bytes, num_cores):
    itemsize = jnp.dtype(dtype).itemsize
    sub = _sublane(dtype)
    row_bytes = hidden * itemsize
    # Byte-based block cap: grow blocks for small hidden, shrink for huge hidden.
    tr = max(sub, _TARGET_BLOCK_BYTES // max(1, row_bytes))
    # Keep >= 2 grid steps per TensorCore (>= 4 total on 2-TC parts) so the
    # pipeline has something to prefetch/write back on every core.
    min_steps = 2 * num_cores
    if rows >= min_steps * sub:
        tr = min(tr, pl.cdiv(rows, min_steps))
    tr = min(tr, rows)
    tr = max(sub, (tr // sub) * sub)
    # Shrink until the pipelined footprint fits comfortably (<= 60% of VMEM).
    while tr > sub and _footprint_bytes(tr, hidden, itemsize) > (vmem_bytes * 3) // 5:
        tr = max(sub, ((tr // 2) // sub) * sub)
    return tr


def _layer_norm_single_pass(x2, weight, bias, tile_rows, vmem_bytes):
    rows, hidden = x2.shape
    itemsize = jnp.dtype(x2.dtype).itemsize
    grid = (pl.cdiv(rows, tile_rows),)

    # TODO(synk): if a v7x profile shows DMA still exposed for bf16 inputs, add
    # pipeline_mode=pl.Buffered(3) to row_spec (input and output).
    row_spec = pl.BlockSpec((tile_rows, hidden), lambda i: (i, 0))
    vec_spec = pl.BlockSpec((1, hidden), lambda i: (0, 0))

    param_bytes = hidden * jnp.dtype(weight.dtype).itemsize
    if bias is not None:
        param_bytes += hidden * jnp.dtype(bias.dtype).itemsize
    cost = pl.CostEstimate(
        flops=7 * rows * hidden,
        transcendentals=rows,
        bytes_accessed=2 * rows * hidden * itemsize + param_bytes,
    )
    params = pltpu.CompilerParams(
        # Single row axis; "parallel" lets Mosaic shard it across both
        # TensorCores on 2-TC parts (v7x); measured no-op on single-TC chips.
        dimension_semantics=("parallel",),
        vmem_limit_bytes=_vmem_limit(
            _footprint_bytes(tile_rows, hidden, itemsize), vmem_bytes),
    )

    out_shape = jax.ShapeDtypeStruct((rows, hidden), x2.dtype)
    w2 = weight.reshape(1, hidden)
    if bias is None:
        return pl.pallas_call(
            _ln_nobias_kernel,
            out_shape=out_shape,
            grid_spec=pltpu.PrefetchScalarGridSpec(
                num_scalar_prefetch=0, grid=grid,
                in_specs=[row_spec, vec_spec], out_specs=row_spec),
            compiler_params=params,
            cost_estimate=cost,
        )(x2, w2)
    b2 = bias.reshape(1, hidden)
    return pl.pallas_call(
        _ln_bias_kernel,
        out_shape=out_shape,
        grid_spec=pltpu.PrefetchScalarGridSpec(
            num_scalar_prefetch=0, grid=grid,
            in_specs=[row_spec, vec_spec, vec_spec], out_specs=row_spec),
        compiler_params=params,
        cost_estimate=cost,
    )(x2, w2, b2)


def _layer_norm_two_pass(x2, weight, bias, vmem_bytes, tile_h=None):
    rows, hidden = x2.shape
    itemsize = jnp.dtype(x2.dtype).itemsize
    sub = _sublane(x2.dtype)
    tile_rows = sub
    hidden_pad = _round_up(hidden, _LANE)
    if tile_h is None:
        th = _TARGET_BLOCK_BYTES // max(1, tile_rows * itemsize)
        tile_h = max(_LANE, (th // _LANE) * _LANE)
    else:
        tile_h = max(_LANE, (int(tile_h) // _LANE) * _LANE)
    tile_h = min(tile_h, hidden_pad)

    grid = (pl.cdiv(rows, tile_rows), pl.cdiv(hidden, tile_h))

    x_spec = pl.BlockSpec((tile_rows, tile_h), lambda i, j: (i, j))
    stat_spec = pl.BlockSpec((tile_rows, 1), lambda i, j: (i, 0))
    vec_spec = pl.BlockSpec((1, tile_h), lambda i, j: (0, j))

    vmem_limit = _vmem_limit(_footprint_bytes(tile_rows, tile_h, itemsize), vmem_bytes)

    # Pass 1: per-row mean / rstd (hidden axis is a reduction -> "arbitrary").
    mean, rstd = pl.pallas_call(
        functools.partial(_stats_kernel, hidden=hidden, tile_h=tile_h),
        out_shape=(jax.ShapeDtypeStruct((rows, 1), jnp.float32),
                   jax.ShapeDtypeStruct((rows, 1), jnp.float32)),
        grid_spec=pltpu.PrefetchScalarGridSpec(
            num_scalar_prefetch=0, grid=grid,
            in_specs=[x_spec],
            out_specs=[stat_spec, stat_spec],
            scratch_shapes=[pltpu.VMEM((tile_rows, 1), jnp.float32),
                            pltpu.VMEM((tile_rows, 1), jnp.float32)]),
        compiler_params=pltpu.CompilerParams(
            dimension_semantics=("parallel", "arbitrary"),
            vmem_limit_bytes=vmem_limit),
    )(x2)

    # Pass 2: normalize + affine (both axes independent).
    out_shape = jax.ShapeDtypeStruct((rows, hidden), x2.dtype)
    apply_params = pltpu.CompilerParams(
        dimension_semantics=("parallel", "parallel"),
        vmem_limit_bytes=vmem_limit)
    w2 = weight.reshape(1, hidden)
    if bias is None:
        return pl.pallas_call(
            _apply_nobias_kernel,
            out_shape=out_shape,
            grid_spec=pltpu.PrefetchScalarGridSpec(
                num_scalar_prefetch=0, grid=grid,
                in_specs=[x_spec, stat_spec, stat_spec, vec_spec],
                out_specs=x_spec),
            compiler_params=apply_params,
        )(x2, mean, rstd, w2)
    b2 = bias.reshape(1, hidden)
    return pl.pallas_call(
        _apply_bias_kernel,
        out_shape=out_shape,
        grid_spec=pltpu.PrefetchScalarGridSpec(
            num_scalar_prefetch=0, grid=grid,
            in_specs=[x_spec, stat_spec, stat_spec, vec_spec, vec_spec],
            out_specs=x_spec),
        compiler_params=apply_params,
    )(x2, mean, rstd, w2, b2)


def layer_norm(x, weight, bias=None, *, tile_rows=None, tile_h=None, two_pass=None):
    """LayerNorm over the last dimension of x.

    x:      (..., hidden)
    weight: (hidden,)
    bias:   (hidden,) or None
    """
    hidden = x.shape[-1]
    assert weight.shape == (hidden,)
    if bias is not None:
        assert bias.shape == (hidden,)

    orig_shape = x.shape
    rows = 1
    for d in orig_shape[:-1]:
        rows *= d
    x2 = x.reshape(rows, hidden)

    itemsize = jnp.dtype(x.dtype).itemsize
    sub = _sublane(x.dtype)
    vmem_bytes, num_cores = _chip_info()

    if two_pass is None:
        # Even the minimum row block would not fit -> split the hidden axis.
        two_pass = _footprint_bytes(sub, hidden, itemsize) > (vmem_bytes * 3) // 5

    if two_pass:
        out = _layer_norm_two_pass(x2, weight, bias, vmem_bytes, tile_h=tile_h)
    else:
        if tile_rows is None:
            tile_rows = _pick_tile_rows(rows, hidden, x.dtype, vmem_bytes, num_cores)
        else:
            tile_rows = max(sub, (int(tile_rows) // sub) * sub)
        out = _layer_norm_single_pass(x2, weight, bias, tile_rows, vmem_bytes)

    return out.reshape(orig_shape)


# ----------------------------------------------------------------------------
# Reference + tests
# ----------------------------------------------------------------------------

def _ref_layer_norm(x, w, b):
    xf = x.astype(jnp.float32)
    mean = jnp.mean(xf, axis=-1, keepdims=True)
    var = jnp.mean((xf - mean) ** 2, axis=-1, keepdims=True)
    y = (xf - mean) / jnp.sqrt(var + EPS) * w.astype(jnp.float32)
    if b is not None:
        y = y + b.astype(jnp.float32)
    return y.astype(x.dtype)


if __name__ == "__main__":
    key = jax.random.PRNGKey(0)
    batch, seq, hidden = 2, 8, 32  # ndim = hidden = 32
    kx, kw, kb, kr, kh = jax.random.split(key, 5)

    x = jax.random.normal(kx, (batch, seq, hidden), dtype=jnp.float32)

    # Module init: weight = ones(ndim); bias = zeros(ndim) if bias else None.
    weight = jnp.ones((hidden,), dtype=jnp.float32)
    bias = jnp.zeros((hidden,), dtype=jnp.float32)

    # bias=True path
    y = jax.block_until_ready(layer_norm(x, weight, bias))
    assert jnp.max(jnp.abs(y - _ref_layer_norm(x, weight, bias))) < 1e-4

    # bias=False path (module with bias=None) -> specialized kernel
    y_nb = jax.block_until_ready(layer_norm(x, weight, None))
    assert jnp.max(jnp.abs(y_nb - _ref_layer_norm(x, weight, None))) < 1e-4

    # Non-trivial affine params (exercise the fused scale + shift)
    w_r = jax.random.normal(kw, (hidden,), dtype=jnp.float32)
    b_r = jax.random.normal(kb, (hidden,), dtype=jnp.float32)
    y_r = jax.block_until_ready(layer_norm(x, w_r, b_r))
    assert jnp.max(jnp.abs(y_r - _ref_layer_norm(x, w_r, b_r))) < 1e-4

    # Ragged row count (rows=15 not a multiple of the tile) -> masked edge block
    x_rag = jax.random.normal(kr, (3, 5, hidden), dtype=jnp.float32)
    y_rag = jax.block_until_ready(layer_norm(x_rag, w_r, b_r))
    assert jnp.max(jnp.abs(y_rag - _ref_layer_norm(x_rag, w_r, b_r))) < 1e-4

    # bf16 input (16-row sublane rounding; f32 accumulation inside the kernel)
    x_bf = jax.random.normal(kh, (batch, seq, hidden), dtype=jnp.bfloat16)
    w_bf = jnp.ones((hidden,), dtype=jnp.bfloat16)
    b_bf = jnp.zeros((hidden,), dtype=jnp.bfloat16)
    y_bf = jax.block_until_ready(layer_norm(x_bf, w_bf, b_bf))
    ref_bf = _ref_layer_norm(x_bf, w_bf, b_bf)
    assert jnp.max(jnp.abs(y_bf.astype(jnp.float32)
                           - ref_bf.astype(jnp.float32))) < 5e-2

    # Split-hidden two-pass fallback (forced) with ragged hidden chunks
    h2 = 200
    xk, wk, bk = jax.random.split(jax.random.PRNGKey(1), 3)
    x2p = jax.random.normal(xk, (4, 6, h2), dtype=jnp.float32)
    w2p = jax.random.normal(wk, (h2,), dtype=jnp.float32)
    b2p = jax.random.normal(bk, (h2,), dtype=jnp.float32)
    y2p = jax.block_until_ready(layer_norm(x2p, w2p, b2p, two_pass=True, tile_h=128))
    assert jnp.max(jnp.abs(y2p - _ref_layer_norm(x2p, w2p, b2p))) < 1e-4

    print("KERNEL_OK")
</pallas_src>

<mosaic_0001>
module attributes {stable_mosaic.version = 11 : i64} {
  func.func @_ln_bias_kernel(%arg0: i32, %arg1: memref<16x32xf32, #tpu.memory_space<vmem>>, %arg2: memref<1x32xf32, #tpu.memory_space<vmem>>, %arg3: memref<1x32xf32, #tpu.memory_space<vmem>>, %arg4: memref<16x32xf32, #tpu.memory_space<vmem>>) attributes {dimension_semantics = [#tpu.dimension_semantics<parallel>], iteration_bounds = array<i64: 1>, scalar_prefetch = 0 : i64, scratch_operands = 0 : i64, tpu.core_type = #tpu.core_type<tc>, window_params = [{transform_indices = @transform_0, window_bounds = array<i64: 16, 32>}, {pipeline_mode = #tpu.pipeline_mode<synchronous>, transform_indices = @transform_1, window_bounds = array<i64: 1, 32>}, {pipeline_mode = #tpu.pipeline_mode<synchronous>, transform_indices = @transform_2, window_bounds = array<i64: 1, 32>}, {transform_indices = @transform_3, window_bounds = array<i64: 16, 32>}]} {
    %c0 = arith.constant 0 : index
    %c0_0 = arith.constant 0 : index
    %0 = vector.load %arg1[%c0, %c0_0] : memref<16x32xf32, #tpu.memory_space<vmem>>, vector<16x32xf32>
    %cst = arith.constant dense<0.000000e+00> : vector<16xf32>
    %1 = vector.multi_reduction <add>, %0, %cst [1] : vector<16x32xf32> to vector<16xf32>
    %2 = vector.shape_cast %1 : vector<16xf32> to vector<16x1xf32>
    %3 = arith.mulf %0, %0 : vector<16x32xf32>
    %cst_1 = arith.constant dense<0.000000e+00> : vector<16xf32>
    %4 = vector.multi_reduction <add>, %3, %cst_1 [1] : vector<16x32xf32> to vector<16xf32>
    %5 = vector.shape_cast %4 : vector<16xf32> to vector<16x1xf32>
    %cst_2 = arith.constant 3.125000e-02 : f32
    %6 = vector.broadcast %cst_2 : f32 to vector<16x1xf32>
    %7 = arith.mulf %2, %6 : vector<16x1xf32>
    %cst_3 = arith.constant 3.125000e-02 : f32
    %8 = vector.broadcast %cst_3 : f32 to vector<16x1xf32>
    %9 = arith.mulf %5, %8 : vector<16x1xf32>
    %10 = arith.mulf %7, %7 : vector<16x1xf32>
    %11 = arith.subf %9, %10 : vector<16x1xf32>
    %cst_4 = arith.constant 0.000000e+00 : f32
    %12 = vector.broadcast %cst_4 : f32 to vector<16x1xf32>
    %13 = arith.maximumf %11, %12 : vector<16x1xf32>
    %cst_5 = arith.constant 9.99999974E-6 : f32
    %14 = vector.broadcast %cst_5 : f32 to vector<16x1xf32>
    %15 = arith.addf %13, %14 : vector<16x1xf32>
    %16 = math.rsqrt %15 : vector<16x1xf32>
    %17 = vector.broadcast %7 : vector<16x1xf32> to vector<16x32xf32>
    %18 = arith.subf %0, %17 : vector<16x32xf32>
    %19 = vector.broadcast %16 : vector<16x1xf32> to vector<16x32xf32>
    %20 = arith.mulf %18, %19 : vector<16x32xf32>
    %c0_6 = arith.constant 0 : index
    %c0_7 = arith.constant 0 : index
    %21 = vector.load %arg2[%c0_6, %c0_7] : memref<1x32xf32, #tpu.memory_space<vmem>>, vector<1x32xf32>
    %22 = vector.broadcast %21 : vector<1x32xf32> to vector<16x32xf32>
    %23 = arith.mulf %20, %22 : vector<16x32xf32>
    %c0_8 = arith.constant 0 : index
    %c0_9 = arith.constant 0 : index
    %24 = vector.load %arg3[%c0_8, %c0_9] : memref<1x32xf32, #tpu.memory_space<vmem>>, vector<1x32xf32>
    %25 = vector.broadcast %24 : vector<1x32xf32> to vector<16x32xf32>
    %26 = arith.addf %23, %25 : vector<16x32xf32>
    %c0_10 = arith.constant 0 : index
    %c0_11 = arith.constant 0 : index
    %27 = vector.load %arg4[%c0_10, %c0_11] : memref<16x32xf32, #tpu.memory_space<vmem>>, vector<16x32xf32>
    tpu.vector_store %arg4[%c0_10, %c0_11], %26 {strides = array<i32>} : memref<16x32xf32, #tpu.memory_space<vmem>>, vector<16x32xf32>,
    return
  }
  func.func @transform_0(%arg0: i32) -> (i32, i32) {
    %c0_i32 = arith.constant 0 : i32
    %c0_i32_0 = arith.constant 0 : i32
    return %arg0, %c0_i32 : i32, i32
  }
  func.func @transform_1(%arg0: i32) -> (i32, i32) {
    %c0_i32 = arith.constant 0 : i32
    %c0_i32_0 = arith.constant 0 : i32
    %c0_i32_1 = arith.constant 0 : i32
    return %c0_i32, %c0_i32_0 : i32, i32
  }
  func.func @transform_2(%arg0: i32) -> (i32, i32) {
    %c0_i32 = arith.constant 0 : i32
    %c0_i32_0 = arith.constant 0 : i32
    %c0_i32_1 = arith.constant 0 : i32
    return %c0_i32, %c0_i32_0 : i32, i32
  }
  func.func @transform_3(%arg0: i32) -> (i32, i32) {
    %c0_i32 = arith.constant 0 : i32
    %c0_i32_0 = arith.constant 0 : i32
    return %arg0, %c0_i32 : i32, i32
  }
}

</mosaic_0001>

<bundles_post_ra>
// kernel: tpu_custom_call.1
= control target key start
LH: loop header
LB: loop body
LE: loop exit
PB: predicated region body
PF: predicated region fallthrough
CT: control target
= control target key end

     0   :  { %8 = vsyncpa [#allocation3], 0  ;;  %s225_s0 = inlined_call_operand.hbm [shape: f32[16,32], index: 0, kind: input, shape index: {}]   ;;  %s226_s1 = inlined_call_operand.vmem [shape: f32[1,32], index: 1, kind: input, shape index: {}]   ;;  %s227_s2 = inlined_call_operand.vmem [shape: f32[1,32], index: 2, kind: input, shape index: {}]   ;;  %s228_s3 = inlined_call_operand.hbm [shape: f32[16,32], index: 3, kind: output, shape index: {}]  }
   0x1   :  { %9 = vsyncpa [#allocation4], 0  ;;  %s159_s12 = smov [#allocation2]   ;;  %s111_s16 = scalar_lea.hbm %s225_s0, 256 }
   0x2   :  { %s15_s13 = sshll.u32 %s159_s12, 4  ;;  %p112_p0 = scmp.ne.s32.totalorder %s225_s0, %s111_s16  ;;  %s16_s13 = int_to_ptr.vmem [resolvable:$true] %s15_s13 }
   0x3   :  { %p115_p1 = scmp.lt.u32.totalorder %s111_s16, %s225_s0 }
   0x5   :  { %p117_p2 = pnand %p115_p1, %p112_p0 }
   0x7   :  { %120 = shalt.err (!%p117_p2)
}
   0x8   :  { %s121_s21 = scalar_lea.vmem %s16_s13, 256  ;;  %p126_p4 = scmp.lt.s32.totalorder %s16_s13, %s16_s13 }
   0x9   :  { %p122_p3 = scmp.ne.s32.totalorder %s16_s13, %s121_s21  ;;  %p127_p5 = scmp.lt.s32.totalorder %s121_s21, %s121_s21 }
   0xb   :  { %p128_p6 = por %p127_p5, %p126_p4 }
   0xd   :  { %p129_p7 = pnand %p128_p6, %p122_p3 }
   0xf   :  { %132 = shalt.err (!%p129_p7)
}
  0x10   :  { %s160_s22 = smov 128   ;;  %s161_s23 = smov 8  }
  0x11   :  { %21 = dma.hbm_to_vmem [thread:$0]  %s225_s0, 256, %s16_s13, [#allocation3], %s160_s22, %s160_s22, %s161_s23  }
  0x12   :  { %155 = dma.done.wait [#allocation3], 256  }
  0x13   :  { %156 = vsyncadd [#allocation3], 4294967040  ;;  %vm31_vm0 = vcmask 261120   ;;  %v29_v0 = vld [vmem:[#allocation2] sm:$0xff]  ;;  %v30_v1 = vld [vmem:[#allocation2 + $0x8] sm:$0xff]  ;;  %s162_s29 = smov [#allocation5]  }
  0x14   :  { %v32_v2 = vsel %vm31_vm0, %v29_v0, 0.0  ;;  %v38_v3 = vmul.f32 %v29_v0, %v29_v0  ;;  %v39_v4 = vmul.f32 %v30_v1, %v30_v1  ;;  %v35_v6 = vsel %vm31_vm0, %v30_v1, 0.0  ;;  %v101_v26 = vld [vmem:[%s226_s1] ss:$0 sm:$0xff]  ;;  %s89_s30 = sshll.u32 %s162_s29, 4  ;;  %s90_s30 = int_to_ptr.vmem [resolvable:$true] %s89_s30 }
  0x15   :  { %33 = vadd.xlane.f32.xlu0 %v32_v2  ;;  %v102_v28 = vld [vmem:[%s227_s2] ss:$0 sm:$0xff]  ;;  %s133_s1 = scalar_lea.vmem %s90_s30, 256  ;;  %p138_p9 = scmp.lt.s32.totalorder %s90_s30, %s90_s30 }
  0x16   :  { %v40_v5 = vsel %vm31_vm0, %v38_v3, 0.0  ;;  %v43_v7 = vsel %vm31_vm0, %v39_v4, 0.0  ;;  %p134_p8 = scmp.ne.s32.totalorder %s90_s30, %s133_s1  ;;  %p139_p10 = scmp.lt.s32.totalorder %s133_s1, %s133_s1 }
  0x17   :  { %41 = vadd.xlane.f32.xlu1 %v40_v5 }
  0x18   :  { %p140_p11 = por %p139_p10, %p138_p9 }
  0x19   :  { %36 = vadd.xlane.f32.xlu0 %v35_v6 }
  0x1a   :  { %p141_p12 = pnand %p140_p11, %p134_p8 }
  0x1b   :  { %44 = vadd.xlane.f32.xlu1 %v43_v7 }
  0xa2   :  { %v34_v8 = vpop.xlane.xlu0 %33 }
  0xa3   :  { %v46_v9 = vmul.f32 0.03125, %v34_v8 }
  0xa4   :  { %v42_v10 = vpop.xlane.xlu1 %41 }
  0xa5   :  { %v50_v11 = vmul.f32 %v46_v9, %v46_v9  ;;  %v48_v12 = vmul.f32 0.03125, %v42_v10  ;;  %v60_v24 = vsub.f32 %v29_v0, %v46_v9 }
  0xa6   :  { %v37_v13 = vpop.xlane.xlu0 %36 }
  0xa7   :  { %v52_v14 = vsub.f32 %v48_v12, %v50_v11  ;;  %v47_v15 = vmul.f32 0.03125, %v37_v13 }
  0xa8   :  { %v45_v16 = vpop.xlane.xlu1 %44 }
  0xa9   :  { %v54_v17 = vmax.f32 %v52_v14, 0.0  ;;  %v51_v18 = vmul.f32 %v47_v15, %v47_v15  ;;  %v49_v19 = vmul.f32 0.03125, %v45_v16  ;;  %v61_v29 = vsub.f32 %v30_v1, %v47_v15 }
  0xab   :  { %v56_v20 = vadd.f32 1e-05, %v54_v17  ;;  %v53_v21 = vsub.f32 %v49_v19, %v51_v18 }
  0xad   :  { %107 = vrsqrt.f32 %v56_v20  ;;  %v55_v22 = vmax.f32 %v53_v21, 0.0 }
  0xaf   :  { %v57_v23 = vadd.f32 1e-05, %v55_v22 }
  0xb1   :  { %109 = vrsqrt.f32 %v57_v23 }
  0xb7   :  { %v108_v25 = vpop.eup %107 }
  0xb8   :  { %v62_v27 = vmul.f32 %v108_v25, %v60_v24 }
  0xba   :  { %v71_v30 = vmul.f32 %v101_v26, %v62_v27 }
  0xbb   :  { %v110_v31 = vpop.eup %109 }
  0xbc   :  { %v63_v32 = vmul.f32 %v110_v31, %v61_v29  ;;  %v80_v33 = vadd.f32 %v102_v28, %v71_v30 }
  0xbe   :  { %v72_v34 = vmul.f32 %v101_v26, %v63_v32  ;;  %82 = vst.msk [vmem:[#allocation5] sm:$0xff] %vm31_vm0, %v80_v33 }
  0xc0   :  { %v81_v35 = vadd.f32 %v102_v28, %v72_v34 }
  0xc2   :  { %83 = vst.msk [vmem:[#allocation5 + $0x8] sm:$0xff] %vm31_vm0, %v81_v35 }
  0xc3   :  { %144 = shalt.err (!%p141_p12)
}
  0xc4   :  { %s145_s5 = scalar_lea.hbm %s228_s3, 256 }
  0xc5   :  { %p146_p13 = scmp.ne.s32.totalorder %s228_s3, %s145_s5  ;;  %p149_p0 = scmp.lt.u32.totalorder %s145_s5, %s228_s3 }
  0xc7   :  { %p151_p1 = pnand %p149_p0, %p146_p13 }
  0xc9   :  { %154 = shalt.err (!%p151_p1)
}
  0xca   :  { %95 = dma.vmem_to_hbm [thread:$0]  %s90_s30, 256, %s228_s3, [#allocation4], %s160_s22, %s160_s22, %s161_s23  }
  0xcb   :  { %157 = dma.done.wait [#allocation4], 256  }
  0xcc   :  { %158 = vsyncadd [#allocation4], 4294967040 }
  0xcd   :  { %99 = vsyncpa [#allocation3], 1 }
  0xce   :  { %100 = vsyncpa [#allocation4], 1 }

</bundles_post_ra>
